<compile_context>
chip_gen: v5e
topology: v5e:2x2
jax: 0.10.0
libtpu: 0.0.40
codegen_flags: <defaults>
</compile_context>

<pallas_src>
import math
from functools import partial

import jax
import jax.numpy as jnp
from jax.experimental import pallas as pl
from jax.experimental.pallas import tpu as pltpu


# ----------------------------------------------------------------------------
# helpers
# ----------------------------------------------------------------------------

def _pick_tile(m, target):
    """Largest tile <= target that divides m and is a multiple of 8 (else m)."""
    if m <= target:
        return m
    for t in range(target, 7, -1):
        if m % t == 0 and t % 8 == 0:
            return t
    return m


# ----------------------------------------------------------------------------
# Linear projection kernels (row-tiled)
# ----------------------------------------------------------------------------

def _linear_kernel(x_ref, w_ref, b_ref, o_ref):
    y = jnp.dot(x_ref[...], w_ref[...], preferred_element_type=jnp.float32)
    o_ref[...] = (y + b_ref[...]).astype(o_ref.dtype)


def _linear_mask_kernel(x_ref, w_ref, b_ref, m_ref, o_ref):
    # masked_fill after the projection: padded positions -> 0
    y = jnp.dot(x_ref[...], w_ref[...], preferred_element_type=jnp.float32)
    y = (y + b_ref[...]) * (1.0 - m_ref[...])
    o_ref[...] = y.astype(o_ref.dtype)


def pallas_linear(x, w, b, mask=None, out_dtype=jnp.float32, block_m=512):
    """x: [N, M, Cin] @ w: [Cin, Cout] + b, optionally zeroed where mask[N, M]."""
    N, M, Cin = x.shape
    Cout = w.shape[1]
    tm = _pick_tile(M, block_m)
    b2 = b.reshape(1, Cout)

    in_specs = [
        pl.BlockSpec((None, tm, Cin), lambda n, m: (n, m, 0)),
        pl.BlockSpec((Cin, Cout), lambda n, m: (0, 0)),
        pl.BlockSpec((1, Cout), lambda n, m: (0, 0)),
    ]
    args = [x, w, b2]
    kernel = _linear_kernel
    if mask is not None:
        m3 = mask.reshape(N, M, 1).astype(jnp.float32)
        in_specs.append(pl.BlockSpec((None, tm, 1), lambda n, m: (n, m, 0)))
        args.append(m3)
        kernel = _linear_mask_kernel

    return pl.pallas_call(
        kernel,
        out_shape=jax.ShapeDtypeStruct((N, M, Cout), out_dtype),
        grid=(N, M // tm),
        in_specs=in_specs,
        out_specs=pl.BlockSpec((None, tm, Cout), lambda n, m: (n, m, 0)),
        compiler_params=pltpu.CompilerParams(
            dimension_semantics=("parallel", "parallel")),
    )(*args)


# ----------------------------------------------------------------------------
# Deformable-sampling core kernel (all heads per grid step, fused output proj)
# ----------------------------------------------------------------------------

def _deform_core_kernel(val_ref, locx_ref, locy_ref, logit_ref,
                        wvec_ref, hvec_ref, wout_ref, bout_ref, out_ref, *,
                        spatial_shapes, n_heads, n_points):
    # val_ref:   (S, C)  bf16     (levels concatenated along rows, level-major)
    # locx/locy: (tq, H*L*P) f32  (column index = h*L*P + l*P + p)
    # logit_ref: (tq, H*L*P) f32
    # wvec/hvec: (1, H*L*P) f32   per-column W_l / H_l lookup
    # wout_ref:  (C, C) f32, bout_ref: (1, C) f32   (fused output projection)
    # out_ref:   (tq, C) f32
    L = len(spatial_shapes)
    P = n_points
    Hh = n_heads
    LP = L * P
    tq = locx_ref.shape[0]
    S, C = val_ref.shape
    Dh = C // Hh

    locx = locx_ref[...]
    locy = locy_ref[...]
    logits = logit_ref[...]
    wv = wvec_ref[...]                                    # (1, HLP)
    hv = hvec_ref[...]

    # ---- per-head softmax over L*P; exp computed once at full lane width ----
    shifted = jnp.concatenate(
        [logits[:, h * LP:(h + 1) * LP]
         - jnp.max(logits[:, h * LP:(h + 1) * LP], axis=-1, keepdims=True)
         for h in range(Hh)], axis=1)                     # (tq, HLP)
    e = jnp.exp(shifted)                                  # single EUP pass
    attn = jnp.concatenate(
        [e[:, h * LP:(h + 1) * LP]
         * pl.reciprocal(jnp.sum(e[:, h * LP:(h + 1) * LP],
                                 axis=-1, keepdims=True), approx=True)
         for h in range(Hh)], axis=1)                     # (tq, HLP)

    # ---- bilinear corner weights / flat indices, full-width (hoisted) -------
    # grid_sample(align_corners=False): pixel coord = loc * size - 0.5
    x = locx * wv - 0.5
    y = locy * hv - 0.5
    x0f = jnp.floor(x)
    y0f = jnp.floor(y)
    lx = x - x0f
    ly = y - y0f
    x0 = x0f.astype(jnp.int32)
    y0 = y0f.astype(jnp.int32)
    wi = wv.astype(jnp.int32)
    hi = hv.astype(jnp.int32)

    flats, wts = [], []
    for dy, dx in ((0, 0), (0, 1), (1, 0), (1, 1)):
        xi = x0 + dx
        yi = y0 + dy
        wxy = (lx if dx == 1 else 1.0 - lx) * (ly if dy == 1 else 1.0 - ly)
        valid = (xi >= 0) & (xi < wi) & (yi >= 0) & (yi < hi)
        wts.append(jnp.where(valid, wxy, 0.0) * attn)               # (tq, HLP)
        xc = jnp.minimum(jnp.maximum(xi, 0), wi - 1)
        yc = jnp.minimum(jnp.maximum(yi, 0), hi - 1)
        flats.append(yc * wi + xc)                                  # (tq, HLP)

    # Per-level position iotas, hoisted out of the head loop
    # (JAX does not CSE broadcast_in_dim).
    iotas = [jax.lax.broadcasted_iota(jnp.int32, (1, 1, h_ * w_), 2)
             for (h_, w_) in spatial_shapes]

    head_outs = []
    for h in range(Hh):
        w_parts = []
        for l in range(L):
            base = h * LP + l * P
            # Fuse the 4 bilinear corners into one (tq, 4P) compare pass.
            fl = jnp.concatenate([f[:, base:base + P] for f in flats], axis=1)
            wt = jnp.concatenate([w[:, base:base + P] for w in wts], axis=1)
            # weighted scatter onto the S_l positions of this level only
            w_l = jnp.sum(jnp.where(fl[:, :, None] == iotas[l],
                                    wt[:, :, None], 0.0), axis=1)   # (tq, S_l)
            w_parts.append(w_l)

        # One lane-contiguous weight slab per head -> single MXU matmul (bf16).
        w_h = jnp.concatenate(w_parts, axis=1).astype(jnp.bfloat16)  # (tq, S)
        v_h = val_ref[:, h * Dh:(h + 1) * Dh]                        # (S, Dh)
        head_outs.append(jnp.dot(w_h, v_h,
                                 preferred_element_type=jnp.float32))

    # Fused output projection + single lane-dense store of all heads.
    core = jnp.concatenate(head_outs, axis=-1)                       # (tq, C)
    y_out = jnp.dot(core, wout_ref[...], preferred_element_type=jnp.float32)
    out_ref[...] = (y_out + bout_ref[...]).astype(out_ref.dtype)


def deform_core(value, locx, locy, logits, wvec, hvec, wout, bout,
                spatial_shapes, n_heads, n_points, q_block=256):
    """value: [N,S,C] bf16; locx/locy/logits: [N,Lq,HLP] f32 -> [N,Lq,C] f32."""
    N, S, C = value.shape
    _, Lq, HLP = locx.shape
    tq = _pick_tile(Lq, q_block)

    kernel = partial(_deform_core_kernel,
                     spatial_shapes=tuple(spatial_shapes),
                     n_heads=n_heads, n_points=n_points)

    return pl.pallas_call(
        kernel,
        out_shape=jax.ShapeDtypeStruct((N, Lq, C), jnp.float32),
        grid=(N, Lq // tq),
        in_specs=[
            pl.BlockSpec((None, S, C), lambda n, q: (n, 0, 0)),
            pl.BlockSpec((None, tq, HLP), lambda n, q: (n, q, 0)),
            pl.BlockSpec((None, tq, HLP), lambda n, q: (n, q, 0)),
            pl.BlockSpec((None, tq, HLP), lambda n, q: (n, q, 0)),
            pl.BlockSpec((1, HLP), lambda n, q: (0, 0)),
            pl.BlockSpec((1, HLP), lambda n, q: (0, 0)),
            pl.BlockSpec((C, C), lambda n, q: (0, 0)),
            pl.BlockSpec((1, C), lambda n, q: (0, 0)),
        ],
        out_specs=pl.BlockSpec((None, tq, C), lambda n, q: (n, q, 0)),
        compiler_params=pltpu.CompilerParams(
            dimension_semantics=("parallel", "parallel"),
            vmem_limit_bytes=48 * 1024 * 1024),
    )(value, locx, locy, logits, wvec, hvec, wout, bout)


# ----------------------------------------------------------------------------
# MSDeformAttn forward (glue in plain JAX, hot paths in Pallas)
# ----------------------------------------------------------------------------

def ms_deform_attn_forward(params, query, reference_points, input_flatten,
                           input_spatial_shapes, input_level_start_index,
                           input_padding_mask):
    N, Lq, C = query.shape
    _, Len_in, _ = input_flatten.shape
    Hh, L, P = params["n_heads"], params["n_levels"], params["n_points"]
    HLP = Hh * L * P

    # spatial shapes / level starts are static metadata (compile-time constants)
    spatial_shapes = tuple((int(h), int(w)) for h, w in input_spatial_shapes)
    level_start = tuple(int(s) for s in input_level_start_index)
    cum = 0
    for l, (h, w) in enumerate(spatial_shapes):
        assert level_start[l] == cum, "level_start_index must be the H*W prefix sum"
        cum += h * w
    assert cum == Len_in

    # value_proj + masked_fill (Pallas); bf16 output = MXU operand for the core
    value = pallas_linear(input_flatten, params["value_proj_w"],
                          params["value_proj_b"], mask=input_padding_mask,
                          out_dtype=jnp.bfloat16)                    # [N,S,C]
    # sampling_offsets / attention_weights linears (Pallas, natural layouts)
    offsets = pallas_linear(query, params["sampling_offsets_w"],
                            params["sampling_offsets_b"])            # [N,Lq,HLP*2]
    logits = pallas_linear(query, params["attention_weights_w"],
                           params["attention_weights_b"])            # [N,Lq,HLP]

    offsets = offsets.reshape(N, Lq, Hh, L, P, 2)
    if reference_points.shape[-1] == 2:
        normalizer = jnp.array([(w, h) for (h, w) in spatial_shapes], jnp.float32)
        loc = (reference_points[:, :, None, :, None, :]
               + offsets / normalizer[None, None, None, :, None, :])
    elif reference_points.shape[-1] == 4:
        loc = (reference_points[:, :, None, :, None, :2]
               + offsets / P * reference_points[:, :, None, :, None, 2:] * 0.5)
    else:
        raise ValueError("Last dim of reference_points must be 2 or 4")
    # tiny elementwise/reshape only (no major-axis transposes)
    locx = loc[..., 0].reshape(N, Lq, HLP)
    locy = loc[..., 1].reshape(N, Lq, HLP)

    # per-column (W_l, H_l) lookup vectors; column order is head-major (h, l, p)
    wvec = jnp.tile(jnp.repeat(jnp.array([w for (_, w) in spatial_shapes],
                                         jnp.float32), P), Hh).reshape(1, HLP)
    hvec = jnp.tile(jnp.repeat(jnp.array([h for (h, _) in spatial_shapes],
                                         jnp.float32), P), Hh).reshape(1, HLP)

    # core sampling kernel with the output projection fused in
    out = deform_core(value, locx, locy, logits, wvec, hvec,
                      params["output_proj_w"],
                      params["output_proj_b"].reshape(1, C),
                      spatial_shapes, Hh, P)                          # [N,Lq,C]
    return out, None


# ----------------------------------------------------------------------------
# Deterministic parameter init (shapes follow MSDeformAttn.__init__)
# ----------------------------------------------------------------------------

def init_params(key, d_model, n_levels, n_heads, n_points):
    thetas = jnp.arange(n_heads, dtype=jnp.float32) * (2.0 * math.pi / n_heads)
    grid_init = jnp.stack([jnp.cos(thetas), jnp.sin(thetas)], axis=-1)
    grid_init = grid_init / jnp.max(jnp.abs(grid_init), axis=-1, keepdims=True)
    grid_init = jnp.tile(grid_init.reshape(n_heads, 1, 1, 2),
                         (1, n_levels, n_points, 1))
    scale = jnp.arange(1, n_points + 1, dtype=jnp.float32).reshape(1, 1, n_points, 1)
    so_b = (grid_init * scale).reshape(-1)

    def xavier(k, fan_in, fan_out):
        bound = math.sqrt(6.0 / (fan_in + fan_out))
        return jax.random.uniform(k, (fan_in, fan_out), jnp.float32, -bound, bound)

    k1, k2, k3, k4 = jax.random.split(key, 4)
    hlp = n_heads * n_levels * n_points
    return dict(
        n_heads=n_heads, n_levels=n_levels, n_points=n_points,
        sampling_offsets_w=0.01 * jax.random.normal(k1, (d_model, hlp * 2), jnp.float32),
        sampling_offsets_b=so_b,
        attention_weights_w=0.1 * jax.random.normal(k2, (d_model, hlp), jnp.float32),
        attention_weights_b=jnp.zeros((hlp,), jnp.float32),
        value_proj_w=xavier(k3, d_model, d_model),
        value_proj_b=jnp.zeros((d_model,), jnp.float32),
        output_proj_w=xavier(k4, d_model, d_model),
        output_proj_b=jnp.zeros((d_model,), jnp.float32),
    )


# ----------------------------------------------------------------------------
# Pure-JAX reference (mirrors the PyTorch semantics) for validation
# ----------------------------------------------------------------------------

def ref_forward(params, query, reference_points, input_flatten,
                spatial_shapes_py, level_start_py, input_padding_mask):
    N, Lq, C = query.shape
    _, S, _ = input_flatten.shape
    Hh, L, P = params["n_heads"], params["n_levels"], params["n_points"]
    Dh = C // Hh

    value = input_flatten @ params["value_proj_w"] + params["value_proj_b"]
    value = jnp.where(input_padding_mask[..., None], 0.0, value)
    value = value.reshape(N, S, Hh, Dh)

    offsets = (query @ params["sampling_offsets_w"]
               + params["sampling_offsets_b"]).reshape(N, Lq, Hh, L, P, 2)
    attn = (query @ params["attention_weights_w"]
            + params["attention_weights_b"]).reshape(N, Lq, Hh, L * P)
    attn = jax.nn.softmax(attn, axis=-1).reshape(N, Lq, Hh, L, P)

    normalizer = jnp.array([[w, h] for (h, w) in spatial_shapes_py], jnp.float32)
    loc = (reference_points[:, :, None, :, None, :]
           + offsets / normalizer[None, None, None, :, None, :])

    out = jnp.zeros((N, Lq, Hh, Dh), jnp.float32)
    nidx = jnp.arange(N)[:, None, None, None]
    hidx = jnp.arange(Hh)[None, None, :, None]
    for l, (H_l, W_l) in enumerate(spatial_shapes_py):
        st = level_start_py[l]
        v_l = value[:, st:st + H_l * W_l].reshape(N, H_l, W_l, Hh, Dh)
        x = loc[:, :, :, l, :, 0] * W_l - 0.5
        y = loc[:, :, :, l, :, 1] * H_l - 0.5
        x0 = jnp.floor(x); y0 = jnp.floor(y)
        lx = x - x0; ly = y - y0
        x0 = x0.astype(jnp.int32); y0 = y0.astype(jnp.int32)
        for dy, dx in ((0, 0), (0, 1), (1, 0), (1, 1)):
            xi = x0 + dx; yi = y0 + dy
            wx = lx if dx == 1 else 1.0 - lx
            wy = ly if dy == 1 else 1.0 - ly
            valid = (xi >= 0) & (xi < W_l) & (yi >= 0) & (yi < H_l)
            samp = v_l[nidx, jnp.clip(yi, 0, H_l - 1),
                       jnp.clip(xi, 0, W_l - 1), hidx]        # [N,Lq,H,P,Dh]
            wt = jnp.where(valid, wx * wy, 0.0) * attn[:, :, :, l, :]
            out = out + (wt[..., None] * samp).sum(axis=3)
    out = out.reshape(N, Lq, C)
    return out @ params["output_proj_w"] + params["output_proj_b"]


# ----------------------------------------------------------------------------

if __name__ == "__main__":
    d_model, n_levels, n_heads, n_points = 32, 4, 8, 4
    N, Lq = 2, 8
    spatial_shapes_py = [(8, 8), (4, 4), (2, 2), (1, 1)]
    level_start_py = [0]
    for (h, w) in spatial_shapes_py[:-1]:
        level_start_py.append(level_start_py[-1] + h * w)
    Len_in = sum(h * w for h, w in spatial_shapes_py)   # 85

    key = jax.random.PRNGKey(0)
    kp, kq, kr, kf, km = jax.random.split(key, 5)
    params = init_params(kp, d_model, n_levels, n_heads, n_points)

    query = jax.random.normal(kq, (N, Lq, d_model), jnp.float32)
    reference_points = jax.random.uniform(kr, (N, Lq, n_levels, 2), jnp.float32)
    input_flatten = jax.random.normal(kf, (N, Len_in, d_model), jnp.float32)
    input_padding_mask = jax.random.uniform(km, (N, Len_in)) < 0.1

    out, _ = ms_deform_attn_forward(params, query, reference_points,
                                    input_flatten, spatial_shapes_py,
                                    level_start_py, input_padding_mask)
    out = jax.block_until_ready(out)
    assert out.shape == (N, Lq, d_model)

    ref = ref_forward(params, query, reference_points, input_flatten,
                      spatial_shapes_py, level_start_py, input_padding_mask)
    max_err = float(jnp.max(jnp.abs(out - ref)))
    assert max_err < 5e-2, f"kernel/reference mismatch: max abs err = {max_err}"

    print("KERNEL_OK")
</pallas_src>

<mosaic_0001>
module attributes {stable_mosaic.version = 11 : i64} {
  func.func @_linear_mask_kernel(%arg0: i32, %arg1: i32, %arg2: memref<1x85x32xf32, #tpu.memory_space<vmem>>, %arg3: memref<32x32xf32, #tpu.memory_space<vmem>>, %arg4: memref<1x32xf32, #tpu.memory_space<vmem>>, %arg5: memref<1x85x1xf32, #tpu.memory_space<vmem>>, %arg6: memref<1x85x32xbf16, #tpu.memory_space<vmem>>) attributes {dimension_semantics = [#tpu.dimension_semantics<parallel>, #tpu.dimension_semantics<parallel>], iteration_bounds = array<i64: 2, 1>, scalar_prefetch = 0 : i64, scratch_operands = 0 : i64, tpu.core_type = #tpu.core_type<tc>, window_params = [{transform_indices = @transform_0, window_bounds = array<i64: 1, 85, 32>}, {pipeline_mode = #tpu.pipeline_mode<synchronous>, transform_indices = @transform_1, window_bounds = array<i64: 32, 32>}, {pipeline_mode = #tpu.pipeline_mode<synchronous>, transform_indices = @transform_2, window_bounds = array<i64: 1, 32>}, {transform_indices = @transform_3, window_bounds = array<i64: 1, 85, 1>}, {transform_indices = @transform_4, window_bounds = array<i64: 1, 85, 32>}]} {
    %c0 = arith.constant 0 : index
    %c0_0 = arith.constant 0 : index
    %c0_1 = arith.constant 0 : index
    %0 = vector.load %arg2[%c0, %c0_0, %c0_1] : memref<1x85x32xf32, #tpu.memory_space<vmem>>, vector<1x85x32xf32>
    %1 = vector.shape_cast %0 : vector<1x85x32xf32> to vector<85x32xf32>
    %c0_2 = arith.constant 0 : index
    %c0_3 = arith.constant 0 : index
    %2 = vector.load %arg3[%c0_2, %c0_3] : memref<32x32xf32, #tpu.memory_space<vmem>>, vector<32x32xf32>
    %cst = arith.constant dense<0.000000e+00> : vector<85x32xf32>
    %3 = tpu.matmul %1, %2, %cst {dimension_numbers = #tpu.dot_dimension_numbers<[1], [0], [0], [1], [0, 0, 1, 1], [], []>} : vector<85x32xf32>, vector<32x32xf32>, vector<85x32xf32> -> vector<85x32xf32>
    %c0_4 = arith.constant 0 : index
    %c0_5 = arith.constant 0 : index
    %4 = vector.load %arg4[%c0_4, %c0_5] : memref<1x32xf32, #tpu.memory_space<vmem>>, vector<1x32xf32>
    %5 = vector.broadcast %4 : vector<1x32xf32> to vector<85x32xf32>
    %6 = arith.addf %3, %5 : vector<85x32xf32>
    %c0_6 = arith.constant 0 : index
    %c0_7 = arith.constant 0 : index
    %c0_8 = arith.constant 0 : index
    %7 = vector.load %arg5[%c0_6, %c0_7, %c0_8] : memref<1x85x1xf32, #tpu.memory_space<vmem>>, vector<1x85x1xf32>
    %8 = vector.shape_cast %7 : vector<1x85x1xf32> to vector<85x1xf32>
    %cst_9 = arith.constant 1.000000e+00 : f32
    %9 = vector.broadcast %cst_9 : f32 to vector<85x1xf32>
    %10 = arith.subf %9, %8 : vector<85x1xf32>
    %11 = vector.broadcast %10 : vector<85x1xf32> to vector<85x32xf32>
    %12 = arith.mulf %6, %11 : vector<85x32xf32>
    %13 = arith.truncf %12 : vector<85x32xf32> to vector<85x32xbf16>
    %c0_10 = arith.constant 0 : index
    %c0_11 = arith.constant 0 : index
    %c0_12 = arith.constant 0 : index
    %14 = vector.load %arg6[%c0_10, %c0_11, %c0_12] : memref<1x85x32xbf16, #tpu.memory_space<vmem>>, vector<1x85x32xbf16>
    %15 = vector.shape_cast %14 : vector<1x85x32xbf16> to vector<85x32xbf16>
    %16 = vector.shape_cast %13 : vector<85x32xbf16> to vector<1x85x32xbf16>
    tpu.vector_store %arg6[%c0_10, %c0_11, %c0_12], %16 {strides = array<i32>} : memref<1x85x32xbf16, #tpu.memory_space<vmem>>, vector<1x85x32xbf16>,
    return
  }
  func.func @transform_0(%arg0: i32, %arg1: i32) -> (i32, i32, i32) {
    %c0_i32 = arith.constant 0 : i32
    %c0_i32_0 = arith.constant 0 : i32
    return %arg0, %arg1, %c0_i32 : i32, i32, i32
  }
  func.func @transform_1(%arg0: i32, %arg1: i32) -> (i32, i32) {
    %c0_i32 = arith.constant 0 : i32
    %c0_i32_0 = arith.constant 0 : i32
    %c0_i32_1 = arith.constant 0 : i32
    return %c0_i32, %c0_i32_0 : i32, i32
  }
  func.func @transform_2(%arg0: i32, %arg1: i32) -> (i32, i32) {
    %c0_i32 = arith.constant 0 : i32
    %c0_i32_0 = arith.constant 0 : i32
    %c0_i32_1 = arith.constant 0 : i32
    return %c0_i32, %c0_i32_0 : i32, i32
  }
  func.func @transform_3(%arg0: i32, %arg1: i32) -> (i32, i32, i32) {
    %c0_i32 = arith.constant 0 : i32
    %c0_i32_0 = arith.constant 0 : i32
    return %arg0, %arg1, %c0_i32 : i32, i32, i32
  }
  func.func @transform_4(%arg0: i32, %arg1: i32) -> (i32, i32, i32) {
    %c0_i32 = arith.constant 0 : i32
    %c0_i32_0 = arith.constant 0 : i32
    return %arg0, %arg1, %c0_i32 : i32, i32, i32
  }
}

</mosaic_0001>

<bundles_post_ra>
// kernel: tpu_custom_call.1
= control target key start
LH: loop header
LB: loop body
LE: loop exit
PB: predicated region body
PF: predicated region fallthrough
CT: control target
= control target key end

     0   :  { %s711_s15 = smov 0   ;;  %s713_s16 = smov 0   ;;  %s840_s0 = inlined_call_operand.vmem [shape: f32[2,85,32], index: 0, kind: input, shape index: {}]   ;;  %s841_s1 = inlined_call_operand.vmem [shape: f32[32,32], index: 1, kind: input, shape index: {}]   ;;  %s842_s2 = inlined_call_operand.vmem [shape: f32[1,32], index: 2, kind: input, shape index: {}]   ;;  %s843_s3 = inlined_call_operand.vmem [shape: f32[2,85,1], index: 3, kind: input, shape index: {}]   ;;  %s844_s4 = inlined_call_operand.vmem [shape: bf16[2,85,32], index: 4, kind: output, shape index: {}]  }
   0x1   :  { %s715_s17 = smov 0  }
   0x2 LB: > { %s26_s18 = sadd.s32 1, %s679_s16  ;;  %p601_p0 = scmp.ge.s32.totalorder %s683_s17, 1  ;;  %s683_s17 = sphi %s715_s17, %s14_s17   ;;  %s679_s16 = sphi %s713_s16, %s846_s16   ;;  %s675_s15 = sphi %s711_s15, %s845_s15  }
   0x3   : > { %p28_p1 = scmp.ge.s32.totalorder %s26_s18, 2  ;;  %p200_p2 = scmp.lt.s32.totalorder %s683_s17, 3 }
   0x5   : > { %s848_s18 = smov (%p28_p1, %s26_s18), 0  ;;  %p201_p3 = pnand %p601_p0, %p200_p2 }
   0x6   : > { %p244_p4 = scmp.lt.s32.totalorder (!%p201_p3), %s675_s15, 1 }
   0x7   : > { %204 = sbr.rel (%p201_p3) target bundleno = 177 (0xb1), region = 36 }
   0xc   : > { %v287_v0 = vld [vmem:[%s841_s1 + $0x18] sm:$0xff]  ;;  %v286_v1 = vld [vmem:[%s841_s1 + $0x10] sm:$0xff]  ;;  %v285_v2 = vld [vmem:[%s841_s1 + $0x8] sm:$0xff]  ;;  %s850_s15 = smov (!%p244_p4, %s675_s15), 1  ;;  %vm292_vm0 = vcmask 261120   ;;  %v685_v12 = vmov 0  }
   0xd   : > { %338 = vmatpush.msra.mxu0 %v287_v0  ;;  %618 = vmatpush.msra.mxu1 %v287_v0  ;;  %v284_v3 = vld [vmem:[%s841_s1] sm:$0xff]  ;;  %s630_s27 = smul.u32 88, %s850_s15  ;;  %vm475_vm1 = vcmask 257024   ;;  %vm486_vm2 = vcmask 256000   ;;  %vm487_vm3 = vsmask.f32 2304 }
   0xe   : > { %619 = vmatpush.msra.mxu2 %v287_v0  ;;  %620 = vmatpush.msra.mxu3 %v287_v0  ;;  %v790_v41 = vld [vmem:[%s842_s2] ss:$0 sm:$0xff]  ;;  %s631_s10 = smul.u32 44, %s850_s15  ;;  %vm488_vm4 = vmand %vm486_vm2, %vm487_vm3 }
   0xf   : > { %339 = vmatpush.msra.mxu0 %v286_v1  ;;  %621 = vmatpush.msra.mxu1 %v286_v1  ;;  %s747_s30 = scalar_lea.vmem %s840_s0, %s630_s27  ;;  %s752_s7 = scalar_lea.vmem %s843_s3, %s630_s27 }
  0x10   : > { %622 = vmatpush.msra.mxu2 %v286_v1  ;;  %623 = vmatpush.msra.mxu3 %v286_v1  ;;  %v273_v4 = vld [vmem:[%s747_s30] sm:$0xff]  ;;  %v276_v5 = vld [vmem:[%s747_s30 + $0x18] sm:$0xff]  ;;  %v279_v6 = vld [vmem:[%s747_s30 + $0x30] sm:$0xff]  ;;  %s798_s13 = scalar_lea.vmem %s844_s4, %s631_s10 }
  0x11   : > { %340 = vmatpush.msra.mxu0 %v285_v2  ;;  %624 = vmatpush.msra.mxu1 %v285_v2  ;;  %v282_v7 = vld [vmem:[%s747_s30 + $0x48] sm:$0xff]  ;;  %v378_v8 = vld [vmem:[%s752_s7 + $0x10] sm:$0xff]  ;;  %v376_v9 = vld [vmem:[%s752_s7] sm:$0xff] }
  0x12   : > { %625 = vmatpush.msra.mxu2 %v285_v2  ;;  %626 = vmatpush.msra.mxu3 %v285_v2  ;;  %v389_v10 = vsub.f32 1.0, %v378_v8  ;;  %v387_v11 = vsub.f32 1.0, %v376_v9  ;;  %v379_v13 = vld [vmem:[%s752_s7 + $0x18] sm:$0xff]  ;;  %v377_v14 = vld [vmem:[%s752_s7 + $0x8] sm:$0xff]  ;;  %v386_v15 = vld [vmem:[%s752_s7 + $0x50] sm:$0x1f] }
  0x13   : > { %341 = vmatpush.msra.mxu0 %v284_v3  ;;  %627 = vmatpush.msra.mxu1 %v284_v3  ;;  %v274_v16 = vld [vmem:[%s747_s30 + $0x8] sm:$0xff]  ;;  %v277_v17 = vld [vmem:[%s747_s30 + $0x20] sm:$0xff]  ;;  %v397_v18 = vsub.f32 1.0, %v386_v15  ;;  %v280_v19 = vld [vmem:[%s747_s30 + $0x38] sm:$0xff]  ;;  %v390_v21 = vsub.f32 1.0, %v379_v13  ;;  %v388_v22 = vsub.f32 1.0, %v377_v14 }
  0x14   : > { %628 = vmatpush.msra.mxu2 %v284_v3  ;;  %629 = vmatpush.msra.mxu3 %v284_v3  ;;  %v283_v20 = vld [vmem:[%s747_s30 + $0x50] sm:$0x1f]  ;;  %v380_v23 = vld [vmem:[%s752_s7 + $0x20] sm:$0xff]  ;;  %v381_v26 = vld [vmem:[%s752_s7 + $0x28] sm:$0xff] }
  0x15   : > { %605 = vmatmul.msk.f32.vlgmr.msra.gmra.mxu0 %vm292_vm0, %v273_v4  ;;  %608 = vmatmul.msk.f32.vlgmr.msra.gmra.mxu1 %vm292_vm0, %v276_v5  ;;  %v391_v24 = vsub.f32 1.0, %v380_v23  ;;  %v382_v25 = vld [vmem:[%s752_s7 + $0x30] sm:$0xff]  ;;  %v278_v28 = vld [vmem:[%s747_s30 + $0x28] sm:$0xff]  ;;  %v281_v29 = vld [vmem:[%s747_s30 + $0x40] sm:$0xff]  ;;  %v392_v31 = vsub.f32 1.0, %v381_v26 }
  0x16   : > { %611 = vmatmul.msk.f32.vlgmr.msra.gmra.mxu2 %vm292_vm0, %v279_v6  ;;  %614 = vmatmul.msk.f32.vlgmr.msra.gmra.mxu3 %vm292_vm0, %v282_v7  ;;  %v275_v27 = vld [vmem:[%s747_s30 + $0x10] sm:$0xff]  ;;  %v393_v30 = vsub.f32 1.0, %v382_v25  ;;  %v383_v32 = vld [vmem:[%s752_s7 + $0x38] sm:$0xff]  ;;  %v385_v34 = vld [vmem:[%s752_s7 + $0x48] sm:$0xff] }
  0x17   : > { %658 = vset.pattern.permute.xlu1 %v685_v12  ;;  %657 = vset.pattern.permute.xlu0 %v685_v12  ;;  %v394_v33 = vsub.f32 1.0, %v383_v32  ;;  %v384_v35 = vld [vmem:[%s752_s7 + $0x40] sm:$0xff]  ;;  %v396_v36 = vsub.f32 1.0, %v385_v34 }
  0x18   : > { %410 = vperm.xlu1 %658, %v389_v10   ;;  %400 = vperm.xlu0 %657, %v387_v11   ;;  %v395_v37 = vsub.f32 1.0, %v384_v35 }
  0x19   : > { %659 = vset.pattern.permute.xlu2 %v685_v12 }
  0x1a   : > { %450 = vperm.xlu2 %659, %v397_v18   ;;  %v489_v18 = vld [vmem:[%s798_s13 + $0x28] sm:$0x7] }
  0x1d   : > { %606 = vmatmul.msk.f32.gmra.mxu0 %vm292_vm0, %v274_v16  ;;  %609 = vmatmul.msk.f32.gmra.mxu1 %vm292_vm0, %v277_v17 }
  0x1e   : > { %612 = vmatmul.msk.f32.gmra.mxu2 %vm292_vm0, %v280_v19  ;;  %615 = vmatmul.msk.f32.gmra.mxu3 %vm292_vm0, %v283_v20 }
  0x20   : > { %415 = vperm.xlu1 %658, %v390_v21   ;;  %405 = vperm.xlu0 %657, %v388_v22  }
  0x22   : > { %420 = vperm.xlu2 %659, %v391_v24  }
  0x25   : > { %607 = vmatmul.msk.f32.gmra.mxu0 %vm292_vm0, %v275_v27  ;;  %610 = vmatmul.msk.f32.gmra.mxu1 %vm292_vm0, %v278_v28 }
  0x26   : > { %613 = vmatmul.msk.f32.gmra.mxu2 %vm292_vm0, %v281_v29 }
  0x28   : > { %430 = vperm.xlu1 %658, %v393_v30   ;;  %425 = vperm.xlu0 %657, %v392_v31  }
  0x2a   : > { %435 = vperm.xlu2 %659, %v394_v33  }
  0x30   : > { %445 = vperm.xlu1 %658, %v396_v36   ;;  %440 = vperm.xlu0 %657, %v395_v37  }
  0x74   : > { %v451_v40 = vpop.permute.xlu2 %450 }
  0x7c   : > { %v421_v50 = vpop.permute.xlu2 %420 }
  0x84   : > { %v436_v7 = vpop.permute.xlu2 %435 }
  0x8a   : > { %v411_v38 = vpop.permute.xlu1 %410  ;;  %v401_v39 = vpop.permute.xlu0 %400 }
  0x92   : > { %v416_v42 = vpop.permute.xlu1 %415  ;;  %v343_v43 = vpop.f32.mrf.mxu0 }
  0x93   : > { %v352_v44 = vpop.f32.mrf.mxu1  ;;  %v344_v45 = vadd.f32 %v790_v41, %v343_v43  ;;  %v406_v47 = vpop.permute.xlu0 %405 }
  0x94   : > { %v353_v46 = vadd.f32 %v790_v41, %v352_v44 }
  0x95   : > { %v453_v48 = vmul.f32 %v401_v39, %v344_v45 }
  0x96   : > { %v456_v49 = vmul.f32 %v416_v42, %v353_v46 }
  0x97   : > { %v464_v51 = vpack.c.bf16 %v453_v48, %v453_v48 }
  0x98   : > { %v467_v52 = vpack.c.bf16 %v456_v49, %v456_v49 }
  0x99   : > { %v361_v53 = vpop.f32.mrf.mxu2  ;;  %v370_v54 = vpop.f32.mrf.mxu3  ;;  %476 = vst.msk [vmem:[%s798_s13] sm:$0xf] %vm475_vm1, %v464_v51 }
  0x9a   : > { %v362_v55 = vadd.f32 %v790_v41, %v361_v53  ;;  %v431_v56 = vpop.permute.xlu1 %430  ;;  %479 = vst.msk [vmem:[%s798_s13 + $0xc] sm:$0xf] %vm475_vm1, %v467_v52  ;;  %v346_v57 = vpop.f32.mrf.mxu0  ;;  %v371_v1 = vadd.f32 %v790_v41, %v370_v54 }
  0x9b   : > { %v355_v58 = vpop.f32.mrf.mxu1  ;;  %v347_v60 = vadd.f32 %v790_v41, %v346_v57  ;;  %v426_v2 = vpop.permute.xlu0 %425 }
  0x9c   : > { %v459_v59 = vmul.f32 %v431_v56, %v362_v55  ;;  %v356_v61 = vadd.f32 %v790_v41, %v355_v58 }
  0x9d   : > { %v454_v63 = vmul.f32 %v406_v47, %v347_v60 }
  0x9e   : > { %v470_v62 = vpack.c.bf16 %v459_v59, %v459_v59  ;;  %v457_v0 = vmul.f32 %v421_v50, %v356_v61 }
  0x9f   : > { %v465_v3 = vpack.c.bf16 %v454_v63, %v454_v63 }
  0xa0   : > { %482 = vst.msk [vmem:[%s798_s13 + $0x18] sm:$0xf] %vm475_vm1, %v470_v62  ;;  %v468_v4 = vpack.c.bf16 %v457_v0, %v457_v0 }
  0xa1   : > { %v364_v5 = vpop.f32.mrf.mxu2  ;;  %v373_v6 = vpop.f32.mrf.mxu3  ;;  %477 = vst.msk [vmem:[%s798_s13 + $0x4] sm:$0xf] %vm475_vm1, %v465_v3 }
  0xa2   : > { %v365_v8 = vadd.f32 %v790_v41, %v364_v5  ;;  %v374_v9 = vadd.f32 %v790_v41, %v373_v6  ;;  %v446_v10 = vpop.permute.xlu1 %445  ;;  %480 = vst.msk [vmem:[%s798_s13 + $0x10] sm:$0xf] %vm475_vm1, %v468_v4  ;;  %v349_v12 = vpop.f32.mrf.mxu0 }
  0xa3   : > { %v462_v11 = vmul.f32 %v446_v10, %v371_v1  ;;  %v358_v13 = vpop.f32.mrf.mxu1  ;;  %v350_v16 = vadd.f32 %v790_v41, %v349_v12  ;;  %v441_v29 = vpop.permute.xlu0 %440 }
  0xa4   : > { %v460_v14 = vmul.f32 %v436_v7, %v365_v8  ;;  %v463_v15 = vmul.f32 %v451_v40, %v374_v9  ;;  %v359_v17 = vadd.f32 %v790_v41, %v358_v13 }
  0xa5   : > { %v473_v19 = vpack.c.bf16 %v462_v11, %v462_v11  ;;  %v455_v22 = vmul.f32 %v411_v38, %v350_v16 }
  0xa6   : > { %v471_v20 = vpack.c.bf16 %v460_v14, %v460_v14  ;;  %v474_v21 = vpack.c.bf16 %v463_v15, %v463_v15  ;;  %v458_v23 = vmul.f32 %v426_v2, %v359_v17 }
  0xa7   : > { %485 = vst.msk [vmem:[%s798_s13 + $0x24] sm:$0xf] %vm475_vm1, %v473_v19  ;;  %v466_v25 = vpack.c.bf16 %v455_v22, %v455_v22 }
  0xa8   : > { %483 = vst.msk [vmem:[%s798_s13 + $0x1c] sm:$0xf] %vm475_vm1, %v471_v20  ;;  %v490_v24 = vsel %vm488_vm4, %v474_v21, %v489_v18  ;;  %v469_v26 = vpack.c.bf16 %v458_v23, %v458_v23 }
  0xa9   : > { %491 = vst [vmem:[%s798_s13 + $0x28] sm:$0x7] %v490_v24  ;;  %v367_v27 = vpop.f32.mrf.mxu2 }
  0xaa   : > { %478 = vst.msk [vmem:[%s798_s13 + $0x8] sm:$0xf] %vm475_vm1, %v466_v25  ;;  %v368_v28 = vadd.f32 %v790_v41, %v367_v27 }
  0xab   : > { %481 = vst.msk [vmem:[%s798_s13 + $0x14] sm:$0xf] %vm475_vm1, %v469_v26 }
  0xac   : > { %v461_v30 = vmul.f32 %v441_v29, %v368_v28 }
  0xae   : > { %v472_v31 = vpack.c.bf16 %v461_v30, %v461_v30 }
  0xb0   : > { %484 = vst.msk [vmem:[%s798_s13 + $0x20] sm:$0xf] %vm475_vm1, %v472_v31 }
  0xb1 PF: > { %s14_s17 = sadd.s32 1, %s683_s17   ;;  %s845_s15 = smov %s679_s16 }
  0xb2   : > { %p11_p5 = scmp.ge.s32.totalorder %s14_s17, 4   ;;  %s846_s16 = smov %s848_s18 }
  0xb4   :  { %13 = sbr.rel (!%p11_p5) target bundleno = 2 (0x2), region = 69 }

</bundles_post_ra>
